<compile_context>
chip_gen: v6e
topology: v6e:2x2x1
jax: 0.10.0
libtpu: 0.0.40
codegen_flags: <defaults>
</compile_context>

<pallas_src>
import math

import jax
import jax.numpy as jnp
from jax.experimental import pallas as pl
from jax.experimental.pallas import tpu as pltpu


def _pos_encoding_kernel(pos_ref, x_ref, o_ref):
    # pos_ref: (TILE_S, 1) f32 absolute positions for this sequence tile.
    # x_ref / o_ref: (1, TILE_S, D) block of the input / output.
    d = x_ref.shape[-1]

    # (1, D) per-feature frequency / phase: O(D) exps, not O(S*D).
    d_idx = jax.lax.broadcasted_iota(jnp.int32, (1, d), 1)
    pair = (d_idx >> 1).astype(jnp.float32)                           # j = i // 2
    inv_freq = jnp.exp(pair * jnp.float32(-2.0 * math.log(10000.0) / d))
    # cos(t) == sin(t + pi/2): a single sin over the tile instead of sin AND cos.
    phase = (d_idx & 1).astype(jnp.float32) * jnp.float32(math.pi / 2.0)

    enc = jnp.sin(pos_ref[...] * inv_freq + phase)                    # (TILE_S, D) f32
    o_ref[...] = x_ref[...] + enc[None].astype(x_ref.dtype)


def _pick_tile_s(S, D, dtype_bytes, target_bytes=1 << 20):
    """Largest seq tile (multiple of 8, or full S) with a block of ~<=1 MiB.

    ~1 MiB blocks keep in+out double-buffering well under the scoped-VMEM
    default on every generation (16 MiB v5e / 32 MiB v6e, v7x) while giving
    plenty of grid steps for DMA/compute overlap.
    """
    rows = max(1, target_bytes // max(1, D * dtype_bytes))
    if rows >= S:
        return S
    rows = max(8, (rows // 8) * 8)
    return min(rows, S)


def positional_encoding(x):
    """x: (B, S, D) -> x + PE[:S].  PE regenerated in-kernel, never stored in HBM."""
    B, S, D = x.shape
    tile_s = _pick_tile_s(S, D, x.dtype.itemsize)
    n_seq_tiles = pl.cdiv(S, tile_s)

    # (S, 1) column of absolute positions: the only position data in HBM (4*S bytes).
    pos = jnp.arange(S, dtype=jnp.float32)[:, None]

    pos_spec = pl.BlockSpec((tile_s, 1), lambda s, b: (s, 0))
    x_spec = pl.BlockSpec((1, tile_s, D), lambda s, b: (b, s, 0))

    kwargs = {}
    if jax.default_backend() == "tpu":
        # Both grid axes are fully independent (encoding is recomputed per block,
        # no carried scratch), so both can shard across v7x TensorCores.
        kwargs["compiler_params"] = pltpu.CompilerParams(
            dimension_semantics=("parallel", "parallel"),
        )

    return pl.pallas_call(
        _pos_encoding_kernel,
        out_shape=jax.ShapeDtypeStruct((B, S, D), x.dtype),
        grid=(n_seq_tiles, B),
        in_specs=[pos_spec, x_spec],
        out_specs=x_spec,
        **kwargs,
    )(pos, x)


def _reference(x):
    """Pure-JAX reference mirroring the PyTorch module exactly."""
    B, S, D = x.shape
    position = jnp.arange(0, S, dtype=jnp.float32)[:, None]                   # (S, 1)
    div_term = jnp.exp(jnp.arange(0, D, 2, dtype=jnp.float32)
                       * (-math.log(10000.0) / D))                            # (D/2,)
    enc = jnp.zeros((S, D), dtype=jnp.float32)
    enc = enc.at[:, 0::2].set(jnp.sin(position * div_term))
    enc = enc.at[:, 1::2].set(jnp.cos(position * div_term))
    return x + enc[None, :, :].astype(x.dtype)


if __name__ == "__main__":
    key = jax.random.PRNGKey(0)
    B, S, D = 2, 8, 512            # small seq/batch; d_model=512 matches the spec
    x = jax.random.normal(key, (B, S, D), dtype=jnp.float32)

    out = positional_encoding(x)
    out = jax.block_until_ready(out)

    ref = _reference(x)
    assert out.shape == ref.shape and out.dtype == ref.dtype
    assert jnp.allclose(out, ref, atol=1e-4, rtol=1e-5), "mismatch vs reference"

    print("KERNEL_OK")
</pallas_src>

<mosaic_0001>
module attributes {stable_mosaic.version = 11 : i64} {
  func.func @_pos_encoding_kernel(%arg0: i32, %arg1: i32, %arg2: memref<8x1xf32, #tpu.memory_space<vmem>>, %arg3: memref<1x8x512xf32, #tpu.memory_space<vmem>>, %arg4: memref<1x8x512xf32, #tpu.memory_space<vmem>>) attributes {dimension_semantics = [#tpu.dimension_semantics<arbitrary>, #tpu.dimension_semantics<arbitrary>], iteration_bounds = array<i64: 1, 2>, scalar_prefetch = 0 : i64, scratch_operands = 0 : i64, tpu.core_type = #tpu.core_type<tc>, window_params = [{transform_indices = @transform_0, window_bounds = array<i64: 8, 1>}, {transform_indices = @transform_1, window_bounds = array<i64: 1, 8, 512>}, {transform_indices = @transform_2, window_bounds = array<i64: 1, 8, 512>}]} {
    %0 = tpu.iota {dimensions = array<i32: 1>} : vector<1x512xi32>
    %c1_i32 = arith.constant 1 : i32
    %1 = vector.broadcast %c1_i32 : i32 to vector<1x512xi32>
    %2 = arith.shrsi %0, %1 : vector<1x512xi32>
    %3 = arith.sitofp %2 : vector<1x512xi32> to vector<1x512xf32>
    %cst = arith.constant -0.0359778926 : f32
    %4 = vector.broadcast %cst : f32 to vector<1x512xf32>
    %5 = arith.mulf %3, %4 : vector<1x512xf32>
    %6 = math.exp %5 : vector<1x512xf32>
    %c1_i32_0 = arith.constant 1 : i32
    %7 = vector.broadcast %c1_i32_0 : i32 to vector<1x512xi32>
    %8 = arith.andi %0, %7 : vector<1x512xi32>
    %9 = arith.sitofp %8 : vector<1x512xi32> to vector<1x512xf32>
    %cst_1 = arith.constant 1.57079637 : f32
    %10 = vector.broadcast %cst_1 : f32 to vector<1x512xf32>
    %11 = arith.mulf %9, %10 : vector<1x512xf32>
    %c0 = arith.constant 0 : index
    %c0_2 = arith.constant 0 : index
    %12 = vector.load %arg2[%c0, %c0_2] : memref<8x1xf32, #tpu.memory_space<vmem>>, vector<8x1xf32>
    %13 = vector.broadcast %12 : vector<8x1xf32> to vector<8x512xf32>
    %14 = vector.broadcast %6 : vector<1x512xf32> to vector<8x512xf32>
    %15 = arith.mulf %13, %14 : vector<8x512xf32>
    %16 = vector.broadcast %11 : vector<1x512xf32> to vector<8x512xf32>
    %17 = arith.addf %15, %16 : vector<8x512xf32>
    %18 = math.sin %17 : vector<8x512xf32>
    %c0_3 = arith.constant 0 : index
    %c0_4 = arith.constant 0 : index
    %c0_5 = arith.constant 0 : index
    %19 = vector.load %arg3[%c0_3, %c0_4, %c0_5] : memref<1x8x512xf32, #tpu.memory_space<vmem>>, vector<1x8x512xf32>
    %20 = vector.shape_cast %18 : vector<8x512xf32> to vector<1x8x512xf32>
    %21 = arith.addf %19, %20 : vector<1x8x512xf32>
    %c0_6 = arith.constant 0 : index
    %c0_7 = arith.constant 0 : index
    %c0_8 = arith.constant 0 : index
    %22 = vector.load %arg4[%c0_6, %c0_7, %c0_8] : memref<1x8x512xf32, #tpu.memory_space<vmem>>, vector<1x8x512xf32>
    tpu.vector_store %arg4[%c0_6, %c0_7, %c0_8], %21 {strides = array<i32>} : memref<1x8x512xf32, #tpu.memory_space<vmem>>, vector<1x8x512xf32>,
    return
  }
  func.func @transform_0(%arg0: i32, %arg1: i32) -> (i32, i32) {
    %c0_i32 = arith.constant 0 : i32
    %c0_i32_0 = arith.constant 0 : i32
    return %arg0, %c0_i32 : i32, i32
  }
  func.func @transform_1(%arg0: i32, %arg1: i32) -> (i32, i32, i32) {
    %c0_i32 = arith.constant 0 : i32
    %c0_i32_0 = arith.constant 0 : i32
    return %arg1, %arg0, %c0_i32 : i32, i32, i32
  }
  func.func @transform_2(%arg0: i32, %arg1: i32) -> (i32, i32, i32) {
    %c0_i32 = arith.constant 0 : i32
    %c0_i32_0 = arith.constant 0 : i32
    return %arg1, %arg0, %c0_i32 : i32, i32, i32
  }
}

</mosaic_0001>

<bundles_post_ra>
// kernel: tpu_custom_call.1
= control target key start
LH: loop header
LB: loop body
LE: loop exit
PB: predicated region body
PF: predicated region fallthrough
CT: control target
= control target key end

     0   :  { %7 = vsyncpa [#allocation3], 0  ;;  %s1519_s0 = inlined_call_operand.vmem [shape: f32[8,1], index: 0, kind: input, shape index: {}]   ;;  %s1520_s1 = inlined_call_operand.hbm [shape: f32[2,8,512], index: 1, kind: input, shape index: {}]   ;;  %s1521_s2 = inlined_call_operand.hbm [shape: f32[2,8,512], index: 2, kind: output, shape index: {}]  }
   0x1   :  { %9 = vsyncpa [#allocation3 + $0x1], 0 }
   0x2   :  { %10 = vsyncpa [#allocation4], 0 }
   0x3   :  { %12 = vsyncpa [#allocation4 + $0x1], 0  ;;  %s1068_s9 = smov 0   ;;  %s1070_s10 = smov 0  }
   0x4   :  { %s1072_s11 = smov 0   ;;  %s1074_s12 = smov 0  }
   0x5   :  { %s1076_s13 = smov 0   ;;  %s1078_s14 = smov 0  }
   0x6 LB: > { %s790_s15 = sadd.s32 4294967295, %s1042_s14   ;;  %s791_s16 = sadd.s32 4294967294, %s1042_s14   ;;  %s1042_s14 = sphi %s1078_s14, %s18_s14   ;;  %s1038_s13 = sphi %s1076_s13, %s1537_s13   ;;  %s1034_s12 = sphi %s1074_s12, %s1536_s12   ;;  %s1030_s11 = sphi %s1072_s11, %s1535_s11   ;;  %s1026_s10 = sphi %s1070_s10, %s1534_s10   ;;  %s1022_s9 = sphi %s1068_s9, %s1533_s9  }
   0x7   : > { %s27_s17 = sadd.s32 1, %s1038_s13  ;;  %s65_s18 = sadd.s32 1, %s1030_s11 }
   0x8   : > { %p28_p0 = scmp.ge.s32.totalorder %s27_s17, 2  ;;  %p72_p1 = scmp.ne.s32.totalorder %s1030_s11, %s1026_s10 }
   0x9   : > { %p73_p2 = scmp.eq.s32.totalorder %s1042_s14, 0  ;;  %p78_p3 = scmp.ne.s32.totalorder %s1026_s10, %s1022_s9 }
   0xa   : > { %s1539_s17 = smov (%p28_p0, %s27_s17), 0  ;;  %p79_p5 = scmp.eq.s32.totalorder %s790_s15, 0 }
   0xb   : > { %p1109_p4 = por %p73_p2, %p72_p1  ;;  %s60_s20 = ssub.s32 %s1038_s13, %s1539_s17 }
   0xc   : > { %p104_p6 = scmp.eq.s32.totalorder %s790_s15, 1  ;;  %p63_p7 = scmp.eq.s32.totalorder %s60_s20, 0 }
   0xd   : > { %p1115_p8 = por %p79_p5, %p78_p3  ;;  %p110_p10 = scmp.eq.s32.totalorder %s791_s16, 1 }
   0xe   : > { %p1119_p9 = por %p104_p6, %p72_p1  ;;  %p852_p13 = scmp.lt.s32.totalorder %s1042_s14, 2 }
   0xf   : > { %s1124_s23 = scalar_select %p63_p7, %s1030_s11, %s65_s18  }
  0x10   : > { %p1126_p11 = por %p110_p10, %p78_p3  ;;  %s137_s25 = sand.u32 1, %s1030_s11  }
  0x11   : > { %s795_s26 = sshll.u32 %s137_s25, 5  ;;  %s822_s27 = sshll.u32 %s1038_s13, 9 }
  0x12   : > { %s1525_s24 = scalar_select %p1126_p11, 1, 0 }
  0x13   : > { %s149_s30 = scalar_lea.hbm %s1520_s1, %s822_s27  ;;  %s141_s3 = scalar_lea.vmem [#allocation2], %s795_s26 }
  0x14   : > { %s151_s4 = sshll.u32 %s141_s3, 4  ;;  %p1139_p0 = pnand %p852_p13, %p1109_p4  ;;  %s152_s4 = int_to_ptr.vmem [resolvable:$true] %s151_s4 }
  0x15   : > { %p798_p1 = scmp.ge.s32.totalorder %s1042_s14, 1  ;;  %p156_p2 = scmp.lt.s32.totalorder %s1042_s14, 3 }
  0x16   : > { %s138_s6 = scalar_lea.sflag [#allocation3], %s137_s25  ;;  %p936_p3 = pneg %p1139_p0 }
  0x17   : > { %s947_s7 = scalar_lea.vmem %s152_s4, 512  ;;  %s1044_s8 = smov [#allocation2]  }
  0x18   : > { %p948_p5 = scmp.ne.s32.totalorder %s152_s4, %s947_s7  ;;  %s952_s15 = sshll.u32 %s1044_s8, 4  ;;  %s953_s15 = int_to_ptr.vmem [resolvable:$false] %s952_s15 }
  0x19   : > { %s954_s16 = scalar_lea.vmem %s953_s15, 1024  ;;  %p955_p10 = scmp.lt.s32.totalorder %s152_s4, %s953_s15 }
  0x1a   : > { %p950_p6 = pnand %p948_p5, %p936_p3  ;;  %p956_p12 = scmp.lt.s32.totalorder %s954_s16, %s947_s7 }
  0x1c   : > { %p951_p7 = pneg %p950_p6  ;;  %p957_p4 = por %p956_p12, %p955_p10 }
  0x1e   : > { %p958_p13 = pnand %p957_p4, %p951_p7 }
  0x20   : > { %961 = shalt.err (!%p958_p13)
}
  0x21   : > { %847 = dma.hbm_to_vmem [thread:$0]  (!%p1139_p0), %s149_s30, 512, %s152_s4, %s138_s6  }
  0x22   : > { %p157_p11 = pnand %p798_p1, %p156_p2 }
  0x23   : > { %s1154_s18 = sand.u32 (!%p157_p11), 1, %s1026_s10  }
  0x24   : > { %160 = sbr.rel (%p157_p11) target bundleno = 323 (0x143), region = 28  ;;  %s799_s19 = sshll.u32 (!%p157_p11), %s1154_s18, 5 }
  0x25   : > { %s163_s20 = scalar_lea.sflag (!%p157_p11), [#allocation3], %s1154_s18  ;;  %s1160_s25 = scalar_lea.vmem (!%p157_p11), [#allocation2], %s799_s19 }
  0x29   : > { %1013 = dma.done.wait (%p1115_p8), %s163_s20, 512  }
  0x2a   : > { %1015 = vsyncadd (%p1115_p8), %s163_s20, 4294966784  ;;  %v1045_v0 = vmov 0   ;;  %v232_v1 = vld [vmem:[%s1519_s0] sm:$0xff]  ;;  %v195_v2 = vlaneseq  ;;  %s1449_s21 = scalar_lea.vmem [#allocation5], %s799_s19  ;;  %s823_s28 = sshll.u32 %s1034_s12, 9 }
  0x2b   : > { %909 = vset.pattern.permute.xlu0 %v1045_v0  ;;  %s691_s29 = sshll.u32 %s1449_s21, 4  ;;  %s689_s4 = scalar_lea.hbm %s1521_s2, %s823_s28  ;;  %s692_s29 = int_to_ptr.vmem [resolvable:$true] %s691_s29 }
  0x2c   : > { %235 = vperm.xlu0 %909, %v232_v1   ;;  %v196_v3 = vand.u32 127, %v195_v2  ;;  %s675_s5 = scalar_lea.sflag [#allocation4], %s1154_s18  ;;  %s962_s6 = scalar_lea.vmem %s692_s29, 512 }
  0x2d   : > { %p963_p8 = scmp.ne.s32.totalorder %s692_s29, %s962_s6  ;;  %s1052_s7 = smov [#allocation5]  }
  0x2e   : > { %v197_v4 = vadd.s32 128, %v196_v3  ;;  %v198_v5 = vadd.s32 256, %v196_v3  ;;  %v200_v6 = vshra.s32 %v196_v3, 1  ;;  %v199_v12 = vadd.s32 384, %v196_v3  ;;  %s966_s12 = sshll.u32 %s1052_s7, 4  ;;  %s967_s12 = int_to_ptr.vmem [resolvable:$false] %s966_s12 }
  0x2f   : > { %v220_v23 = vand.u32 1, %v196_v3  ;;  %p964_p11 = pnand %p963_p8, %p1119_p9  ;;  %s968_s8 = scalar_lea.vmem %s967_s12, 1024 }
  0x30   : > { %v201_v7 = vshra.s32 %v197_v4, 1  ;;  %v202_v8 = vshra.s32 %v198_v5, 1  ;;  %v204_v9 = vcvt.s32.f32 %v200_v6  ;;  %v203_v16 = vshra.s32 %v199_v12, 1  ;;  %p969_p0 = scmp.lt.s32.totalorder %s692_s29, %s967_s12  ;;  %p970_p1 = scmp.lt.s32.totalorder %s968_s8, %s962_s6 }
  0x31   : > { %v221_v24 = vand.u32 1, %v197_v4  ;;  %v222_v25 = vand.u32 1, %v198_v5  ;;  %v224_v26 = vcvt.s32.f32 %v220_v23  ;;  %v223_v39 = vand.u32 1, %v199_v12  ;;  %p965_p12 = pneg %p964_p11 }
  0x32   : > { %v205_v10 = vcvt.s32.f32 %v201_v7  ;;  %v206_v11 = vcvt.s32.f32 %v202_v8  ;;  %v208_v13 = vmul.f32 -0.035977893, %v204_v9  ;;  %v207_v20 = vcvt.s32.f32 %v203_v16  ;;  %p971_p2 = por %p970_p1, %p969_p0 }
  0x33   : > { %v225_v27 = vcvt.s32.f32 %v221_v24  ;;  %v226_v29 = vcvt.s32.f32 %v222_v25  ;;  %v228_v32 = vmul.f32 1.5707964, %v224_v26  ;;  %v227_v45 = vcvt.s32.f32 %v223_v39 }
  0x34   : > { %v209_v14 = vmul.f32 -0.035977893, %v205_v10  ;;  %v210_v15 = vmul.f32 -0.035977893, %v206_v11  ;;  %v212_v17 = vmul.f32 1.442695, %v208_v13  ;;  %p972_p3 = pnand %p971_p2, %p965_p12 }
  0x35   : > { %v211_v21 = vmul.f32 -0.035977893, %v207_v20  ;;  %v229_v33 = vmul.f32 1.5707964, %v225_v27  ;;  %v230_v35 = vmul.f32 1.5707964, %v226_v29 }
  0x36   : > { %v214_v18 = vmul.f32 1.442695, %v209_v14  ;;  %v216_v19 = vmul.f32 1.442695, %v210_v15  ;;  %910 = vpow2.f32 %v212_v17  ;;  %v231_v55 = vmul.f32 1.5707964, %v227_v45 }
  0x37   : > { %v218_v22 = vmul.f32 1.442695, %v211_v21  ;;  %v1046_v11 = vmov 683565275   ;;  %v1047_v15 = vmov 2475754826  }
  0x38   : > { %912 = vpow2.f32 %v214_v18  ;;  %v1048_v17 = vmov 2131351028   ;;  %v1050_v21 = vmov 920167782  }
  0x39   : > { %914 = vpow2.f32 %v216_v19  ;;  %v1049_v19 = vmov 2102212464  }
  0x3a   : > { %916 = vpow2.f32 %v218_v22 }
  0x43   : > { %v911_v28 = vpop.eup %910 }
  0x45   : > { %v913_v30 = vpop.eup %912 }
  0x46   : > { %v915_v31 = vpop.eup %914 }
  0x47   : > { %v917_v50 = vpop.eup %916 }
  0xa7   : > { %v236_v34 = vpop.permute.xlu0 %235 }
  0xa8   : > { %v238_v36 = vmul.f32 %v911_v28, %v236_v34  ;;  %v239_v37 = vmul.f32 %v913_v30, %v236_v34  ;;  %v240_v38 = vmul.f32 %v915_v31, %v236_v34  ;;  %v241_v58 = vmul.f32 %v917_v50, %v236_v34 }
  0xa9   : > { %v1051_v28 = vmov 1326507024  }
  0xaa   : > { %v1169_v40 = vadd.f32 %v238_v36, %v228_v32  ;;  %v1171_v41 = vadd.f32 %v239_v37, %v229_v33  ;;  %v1173_v42 = vadd.f32 %v240_v38, %v230_v35  ;;  %v1185_v2 = vadd.f32 %v241_v58, %v231_v55 }
  0xac   : > { %v246_v43 = vand.u32 2147483647, %v1169_v40  ;;  %v249_v44 = vand.u32 2139095040, %v1169_v40  ;;  %v350_v46 = vand.u32 2147483647, %v1171_v41  ;;  %v353_v47 = vand.u32 2139095040, %v1171_v41 }
  0xad   : > { %v457_v53 = vand.u32 2139095040, %v1173_v42  ;;  %v454_v63 = vand.u32 2147483647, %v1173_v42  ;;  %vm248_vm13 = vcmp.lt.s32.totalorder %v1169_v40, 0 }
  0xae   : > { %v250_v48 = vshrl.u32 %v249_v44, 23  ;;  %v253_v49 = vand.u32 8388607, %v246_v43  ;;  %v354_v51 = vshrl.u32 %v353_v47, 23  ;;  %v357_v52 = vand.u32 8388607, %v350_v46 }
  0xaf   : > { %v458_v57 = vshrl.u32 %v457_v53, 23  ;;  %v1193_v8 = vand.u32 8388607, %v454_v63  ;;  %vm1298_vm14 = vcmp.le.f32.partialorder %v246_v43, 0.7853982 }
  0xb0   : > { %v801_v54 = vadd.s32 4294967169, %v250_v48  ;;  %v805_v56 = vadd.s32 4294967169, %v354_v51  ;;  %v254_v59 = vor.u32 8388608, %v253_v49  ;;  %v358_v61 = vor.u32 8388608, %v357_v52 }
  0xb1   : > { %v809_v0 = vadd.s32 4294967169, %v458_v57 }
  0xb2   : > { %v256_v60 = vadd.s32 1, %v801_v54  ;;  %v360_v62 = vadd.s32 1, %v805_v56  ;;  %v1187_v6 = vshll.u32 %v254_v59, 8  ;;  %v1189_v7 = vshll.u32 %v358_v61, 8 }
  0xb3   : > { %v1195_v9 = vadd.s32 1, %v809_v0 }
  0xb4   : > { %vm257_vm0 = vcmp.gt.s32.totalorder %v256_v60, 0  ;;  %vm361_vm1 = vcmp.gt.s32.totalorder %v360_v62, 0 }
  0xb5   : > { %v258_v1 = vsel %vm257_vm0, %v256_v60, 0  ;;  %v362_v5 = vsel %vm361_vm1, %v360_v62, 0  ;;  %vm465_vm6 = vcmp.gt.s32.totalorder %v1195_v9, 0 }
  0xb6   : > { %v259_v3 = vshrl.u32 %v258_v1, 5  ;;  %v260_v4 = vand.u32 31, %v258_v1  ;;  %v1198_v13 = vshrl.u32 %v362_v5, 5  ;;  %v364_v14 = vand.u32 31, %v362_v5 }
  0xb8   : > { %v261_v10 = vsub.s32 32, %v260_v4  ;;  %v263_v12 = vshll.u32 %v1046_v11, %v260_v4  ;;  %v266_v16 = vshll.u32 %v1047_v15, %v260_v4  ;;  %v269_v18 = vshll.u32 %v1048_v17, %v260_v4 }
  0xb9   : > { %v272_v20 = vshll.u32 %v1049_v19, %v260_v4  ;;  %v275_v22 = vshll.u32 %v1050_v21, %v260_v4  ;;  %vm278_vm2 = vcmp.lt.s32.totalorder %v259_v3, 1  ;;  %vm279_vm3 = vcmp.lt.s32.totalorder %v259_v3, 2 }
  0xba   : > { %v264_v23 = vshrl.u32 %v1047_v15, %v261_v10  ;;  %v267_v24 = vshrl.u32 %v1048_v17, %v261_v10  ;;  %v270_v25 = vshrl.u32 %v1049_v19, %v261_v10  ;;  %v262_v26 = vshrl.u32 %v1046_v11, %v261_v10 }
  0xbb   : > { %v273_v27 = vshrl.u32 %v1050_v21, %v261_v10  ;;  %v276_v29 = vshrl.u32 %v1051_v28, %v261_v10  ;;  %v365_v33 = vsub.s32 32, %v364_v14  ;;  %vm280_vm4 = vcmp.lt.s32.totalorder %v259_v3, 3 }
  0xbc   : > { %v265_v30 = vor.u32 %v264_v23, %v263_v12  ;;  %v268_v31 = vor.u32 %v267_v24, %v266_v16  ;;  %v271_v32 = vor.u32 %v270_v25, %v269_v18  ;;  %vm281_vm5 = vcmp.lt.s32.totalorder %v259_v3, 4 }
  0xbd   : > { %v274_v34 = vor.u32 %v273_v27, %v272_v20  ;;  %v277_v35 = vor.u32 %v276_v29, %v275_v22  ;;  %v367_v48 = vshll.u32 %v1046_v11, %v364_v14  ;;  %v368_v51 = vshrl.u32 %v1047_v15, %v365_v33 }
  0xbe   : > { %v282_v36 = vsel %vm278_vm2, %v262_v26, %v265_v30  ;;  %v283_v37 = vsel %vm281_vm5, %v271_v32, 2102212464  ;;  %v286_v38 = vsel %vm278_vm2, %v265_v30, %v268_v31  ;;  %v290_v39 = vsel %vm278_vm2, %v268_v31, %v271_v32 }
  0xbf   : > { %v284_v44 = vsel %vm280_vm4, %v268_v31, %v283_v37  ;;  %v287_v45 = vsel %vm281_vm5, %v274_v34, 920167782  ;;  %v291_v47 = vsel %vm281_vm5, %v277_v35, 1326507024  ;;  %v370_v52 = vshll.u32 %v1047_v15, %v364_v14 }
  0xc0   : > { %v288_v49 = vsel %vm280_vm4, %v271_v32, %v287_v45  ;;  %v292_v50 = vsel %vm280_vm4, %v274_v34, %v291_v47  ;;  %v285_v53 = vsel %vm279_vm3, %v282_v36, %v284_v44  ;;  %v371_v56 = vshrl.u32 %v1048_v17, %v365_v33 }
  0xc1   : > { %v289_v54 = vsel %vm279_vm3, %v286_v38, %v288_v49  ;;  %v293_v55 = vsel %vm279_vm3, %v290_v39, %v292_v50  ;;  %v369_v61 = vor.u32 %v368_v51, %v367_v48  ;;  %v373_v0 = vshll.u32 %v1048_v17, %v364_v14 }
  0xc2   : > { %v1222_v57 = vmul.u32.u64.low %v1187_v6, %v293_v55  ;;  %v1223_v58 = vmul.u32.u64.high %v1187_v6, %v293_v55, %v1222_v57  ;;  %v1226_v59 = vmul.u32.u64.low %v1187_v6, %v289_v54  ;;  %v1227_v60 = vmul.u32.u64.high %v1187_v6, %v289_v54, %v1226_v59 }
  0xc3   : > { %v372_v62 = vor.u32 %v371_v56, %v370_v52  ;;  %v374_v1 = vshrl.u32 %v1049_v19, %v365_v33  ;;  %v366_v3 = vshrl.u32 %v1046_v11, %v365_v33  ;;  %v376_v4 = vshll.u32 %v1049_v19, %v364_v14 }
  0xc4   : > { %v377_v5 = vshrl.u32 %v1050_v21, %v365_v33  ;;  %v380_v10 = vshrl.u32 %v1051_v28, %v365_v33  ;;  %v301_v12 = vmul.u32 %v1187_v6, %v285_v53  ;;  %v379_v18 = vshll.u32 %v1050_v21, %v364_v14 }
  0xc5   : > { %v375_v16 = vor.u32 %v374_v1, %v373_v0  ;;  %vm382_vm7 = vcmp.lt.s32.totalorder %v1198_v13, 1  ;;  %vm303_vm8 = vc.u32 %v1223_v58, %v1226_v59  ;;  %v304_v20 = vadd.s32 1, %v1227_v60 }
  0xc6   : > { %v378_v22 = vor.u32 %v377_v5, %v376_v4  ;;  %vm383_vm9 = vcmp.lt.s32.totalorder %v1198_v13, 2  ;;  %v381_v23 = vor.u32 %v380_v10, %v379_v18  ;;  %vm384_vm10 = vcmp.lt.s32.totalorder %v1198_v13, 3 }
  0xc7   : > { %vm385_vm11 = vcmp.lt.s32.totalorder %v1198_v13, 4  ;;  %v390_v24 = vsel %vm382_vm7, %v369_v61, %v372_v62  ;;  %v305_v6 = vsel %vm303_vm8, %v304_v20, %v1227_v60  ;;  %v394_v26 = vsel %vm382_vm7, %v372_v62, %v375_v16 }
  0xc8   : > { %v387_v25 = vsel %vm385_vm11, %v375_v16, 2102212464  ;;  %v391_v14 = vsel %vm385_vm11, %v378_v22, 920167782  ;;  %v306_v27 = vadd.s32 %v305_v6, %v301_v12  ;;  %v386_v29 = vsel %vm382_vm7, %v366_v3, %v369_v61 }
  0xc9   : > { %v392_v30 = vsel %vm384_vm10, %v375_v16, %v391_v14  ;;  %v395_v31 = vsel %vm385_vm11, %v381_v23, 1326507024  ;;  %v388_v32 = vsel %vm384_vm10, %v372_v62, %v387_v25  ;;  %v466_v35 = vsel %vm465_vm6, %v1195_v9, 0 }
  0xca   : > { %v393_v33 = vsel %vm383_vm9, %v390_v24, %v392_v30  ;;  %v396_v34 = vsel %vm384_vm10, %v378_v22, %v395_v31  ;;  %v307_v36 = vadd.s32 536870912, %v306_v27  ;;  %v389_v48 = vsel %vm383_vm9, %v386_v29, %v388_v32 }
  0xcb   : > { %v397_v37 = vsel %vm383_vm9, %v394_v26, %v396_v34  ;;  %v1254_v38 = vmul.u32.u64.low %v1189_v7, %v393_v33  ;;  %v1255_v39 = vmul.u32.u64.high %v1189_v7, %v393_v33, %v1254_v38  ;;  %v468_v49 = vand.u32 31, %v466_v35 }
  0xcc   : > { %v1259_v44 = vmul.u32.u64.low %v1189_v7, %v397_v37  ;;  %v1260_v45 = vmul.u32.u64.high %v1189_v7, %v397_v37, %v1259_v44  ;;  %v308_v47 = vshrl.u32 %v307_v36, 30  ;;  %v462_v9 = vor.u32 8388608, %v1193_v8 }
  0xcd   : > { %v558_v50 = vand.u32 2147483647, %v1185_v2  ;;  %v408_v52 = vadd.s32 1, %v1255_v39  ;;  %v469_v53 = vsub.s32 32, %v468_v49  ;;  %v561_v54 = vand.u32 2139095040, %v1185_v2 }
  0xce   : > { %v309_v51 = vshll.u32 %v308_v47, 30  ;;  %v405_v55 = vmul.u32 %v1189_v7, %v389_v48  ;;  %vm407_vm12 = vc.u32 %v1260_v45, %v1254_v38  ;;  %v1276_v60 = vshll.u32 %v462_v9, 8 }
  0xcf   : > { %v409_v13 = vsel %vm407_vm12, %v408_v52, %v1255_v39  ;;  %v472_v57 = vshrl.u32 %v1047_v15, %v469_v53  ;;  %v1280_v61 = vand.u32 8388607, %v558_v50  ;;  %v475_v62 = vshrl.u32 %v1048_v17, %v469_v53 }
  0xd0   : > { %v1271_v56 = vsub.s32 %v306_v27, %v309_v51  ;;  %v410_v8 = vadd.s32 %v409_v13, %v405_v55  ;;  %v478_v0 = vshrl.u32 %v1049_v19, %v469_v53  ;;  %v562_v1 = vshrl.u32 %v561_v54, 23 }
  0xd1   : > { %v332_v3 = vsub.s32 4, %v308_v47  ;;  %v1285_v5 = vshrl.u32 %v466_v35, 5  ;;  %v471_v10 = vshll.u32 %v1046_v11, %v468_v49  ;;  %v474_v16 = vshll.u32 %v1047_v15, %v468_v49 }
  0xd2   : > { %v312_v7 = vsub.s32 0, %v1271_v56  ;;  %v411_v4 = vadd.s32 536870912, %v410_v8  ;;  %v477_v18 = vshll.u32 %v1048_v17, %v468_v49  ;;  %v481_v20 = vshrl.u32 %v1050_v21, %v469_v53 }
  0xd3   : > { %v473_v23 = vor.u32 %v472_v57, %v471_v10  ;;  %v480_v24 = vshll.u32 %v1049_v19, %v468_v49  ;;  %v484_v6 = vshrl.u32 %v1051_v28, %v469_v53  ;;  %v476_v26 = vor.u32 %v475_v62, %v474_v16 }
  0xd4   : > { %v802_v12 = vmin.u32 %v312_v7, %v1271_v56  ;;  %v1292_v22 = vshrl.u32 %v411_v4, 30  ;;  %v479_v27 = vor.u32 %v478_v0, %v477_v18  ;;  %v483_v29 = vshll.u32 %v1050_v21, %v468_v49 }
  0xd5   : > { %v302_v30 = vadd.s32 %v1226_v59, %v1223_v58  ;;  %v482_v32 = vor.u32 %v481_v20, %v480_v24  ;;  %v813_v33 = vadd.s32 4294967169, %v562_v1  ;;  %vm486_vm15 = vcmp.lt.s32.totalorder %v1285_v5, 1 }
  0xd6   : > { %v314_v14 = vclz %v802_v12  ;;  %v413_v31 = vshll.u32 %v1292_v22, 30  ;;  %v485_v35 = vor.u32 %v484_v6, %v483_v29  ;;  %vm489_vm0 = vcmp.lt.s32.totalorder %v1285_v5, 4 }
  0xd7   : > { %vm487_vm1 = vcmp.lt.s32.totalorder %v1285_v5, 2  ;;  %vm488_vm2 = vcmp.lt.s32.totalorder %v1285_v5, 3  ;;  %v495_v36 = vsel %vm489_vm0, %v482_v32, 920167782  ;;  %v333_v58 = vsel %vm248_vm13, %v332_v3, %v308_v47 }
  0xd8   : > { %v803_v34 = vadd.s32 4294967294, %v314_v14  ;;  %v1308_v43 = vsub.s32 %v410_v8, %v413_v31  ;;  %v494_v59 = vsel %vm486_vm15, %v473_v23, %v476_v26  ;;  %v496_v37 = vsel %vm488_vm2, %v479_v27, %v495_v36 }
  0xd9   : > { %v470_v48 = vshrl.u32 %v1046_v11, %v469_v53  ;;  %v498_v49 = vsel %vm486_vm15, %v476_v26, %v479_v27  ;;  %v491_v52 = vsel %vm489_vm0, %v479_v27, 2102212464  ;;  %v499_v47 = vsel %vm489_vm0, %v485_v35, 1326507024 }
  0xda   : > { %vm804_vm3 = vcmp.lt.s32.totalorder %v803_v34, 0  ;;  %v416_v44 = vsub.s32 0, %v1308_v43  ;;  %v497_v13 = vsel %vm487_vm1, %v494_v59, %v496_v37  ;;  %v500_v53 = vsel %vm488_vm2, %v482_v32, %v499_v47 }
  0xdb   : > { %v317_v39 = vsel %vm804_vm3, 0, %v803_v34  ;;  %v501_v7 = vsel %vm487_vm1, %v498_v49, %v500_v53  ;;  %v568_v62 = vadd.s32 1, %v813_v33  ;;  %v335_v0 = vsel %vm1298_vm14, 0, %v333_v58 }
  0xdc   : > { %v318_v9 = vsub.s32 32, %v317_v39  ;;  %v322_v51 = vsub.s32 4294967266, %v317_v39  ;;  %v319_v54 = vshll.u32 %v1271_v56, %v317_v39  ;;  %v806_v55 = vmin.u32 %v416_v44, %v1308_v43 }
  0xdd   : > { %v490_v56 = vsel %vm486_vm15, %v470_v48, %v473_v23  ;;  %v492_v3 = vsel %vm488_vm2, %v476_v26, %v491_v52  ;;  %v1343_v12 = vmul.u32.u64.low %v1276_v60, %v501_v7  ;;  %v1344_v16 = vmul.u32.u64.high %v1276_v60, %v501_v7, %v1343_v12 }
  0xde   : > { %v320_v8 = vshrl.u32 %v302_v30, %v318_v9  ;;  %v323_v57 = vadd.s32 127, %v322_v51  ;;  %v418_v1 = vclz %v806_v55  ;;  %vm569_vm4 = vcmp.gt.s32.totalorder %v568_v62, 0 }
  0xdf   : > { %v1347_v20 = vmul.u32.u64.low %v1276_v60, %v497_v13  ;;  %v1348_v24 = vmul.u32.u64.high %v1276_v60, %v497_v13, %v1347_v20  ;;  %v406_v23 = vadd.s32 %v1254_v38, %v1260_v45  ;;  %v566_v14 = vor.u32 8388608, %v1280_v61 }
  0xe0   : > { %v321_v4 = vor.u32 %v320_v8, %v319_v54  ;;  %v324_v10 = vshll.u32 %v323_v57, 23  ;;  %v807_v18 = vadd.s32 4294967294, %v418_v1  ;;  %v570_v26 = vsel %vm569_vm4, %v568_v62, 0 }
  0xe1   : > { %v339_v27 = vadd.s32 3, %v335_v0  ;;  %v493_v29 = vsel %vm487_vm1, %v490_v56, %v492_v3  ;;  %v572_v30 = vand.u32 31, %v570_v26  ;;  %vm511_vm6 = vc.u32 %v1344_v16, %v1347_v20 }
  0xe2   : > { %v325_v6 = vor.u32 4788187, %v324_v10  ;;  %vm808_vm5 = vcmp.lt.s32.totalorder %v807_v18, 0  ;;  %v328_v32 = vcvt.s32.f32 %v321_v4  ;;  %v436_v36 = vsub.s32 4, %v1292_v22 }
  0xe3   : > { %v421_v33 = vsel %vm808_vm5, 0, %v807_v18  ;;  %v512_v38 = vadd.s32 1, %v1348_v24  ;;  %v509_v61 = vmul.u32 %v1276_v60, %v493_v29  ;;  %v1361_v58 = vshrl.u32 %v570_v26, 5 }
  0xe4   : > { %v326_v31 = vand.u32 2147483647, %v325_v6  ;;  %v422_v34 = vsub.s32 32, %v421_v33  ;;  %v426_v35 = vsub.s32 4294967266, %v421_v33  ;;  %v573_v5 = vsub.s32 32, %v572_v30 }
  0xe5   : > { %v423_v59 = vshll.u32 %v1308_v43, %v421_v33  ;;  %v513_v44 = vsel %vm511_vm6, %v512_v38, %v1348_v24  ;;  %v575_v9 = vshll.u32 %v1046_v11, %v572_v30  ;;  %v578_v54 = vshll.u32 %v1047_v15, %v572_v30 }
  0xe6   : > { %v329_v45 = vmul.f32 %v328_v32, %v326_v31  ;;  %v424_v37 = vshrl.u32 %v406_v23, %v422_v34  ;;  %v427_v39 = vadd.s32 127, %v426_v35  ;;  %v514_v49 = vadd.s32 %v513_v44, %v509_v61 }
  0xe7   : > { %v576_v51 = vshrl.u32 %v1047_v15, %v573_v5  ;;  %v579_v60 = vshrl.u32 %v1048_v17, %v573_v5  ;;  %v581_v13 = vshll.u32 %v1048_v17, %v572_v30  ;;  %v582_v53 = vshrl.u32 %v1049_v19, %v573_v5 }
  0xe8   : > { %v330_v48 = vxor.u32 2147483648, %v329_v45  ;;  %v425_v52 = vor.u32 %v424_v37, %v423_v59  ;;  %v428_v47 = vshll.u32 %v427_v39, 23  ;;  %v515_v43 = vadd.s32 536870912, %v514_v49 }
  0xe9   : > { %v577_v7 = vor.u32 %v576_v51, %v575_v9  ;;  %v584_v62 = vshll.u32 %v1049_v19, %v572_v30  ;;  %v585_v1 = vshrl.u32 %v1050_v21, %v573_v5  ;;  %v580_v3 = vor.u32 %v579_v60, %v578_v54 }
  0xea   : > { %v331_v55 = vsel %vm248_vm13, %v330_v48, %v329_v45  ;;  %v429_v57 = vor.u32 4788187, %v428_v47  ;;  %v432_v15 = vcvt.s32.f32 %v425_v52  ;;  %v1377_v0 = vshrl.u32 %v515_v43, 30 }
  0xeb   : > { %v334_v8 = vsel %vm1298_vm14, %v1169_v40, %v331_v55  ;;  %v588_v17 = vshrl.u32 %v1051_v28, %v573_v5  ;;  %vm1383_vm7 = vcmp.le.f32.partialorder %v350_v46, 0.7853982  ;;  %vm352_vm8 = vcmp.lt.s32.totalorder %v1171_v41, 0 }
  0xec   : > { %918 = vcosq.f32 %v334_v8  ;;  %v430_v56 = vand.u32 2147483647, %v429_v57  ;;  %v517_v19 = vshll.u32 %v1377_v0, 30  ;;  %v586_v4 = vor.u32 %v585_v1, %v584_v62 }
  0xed   : > { %920 = vsinq.f32 %v334_v8  ;;  %v340_v10 = vand.u32 3, %v339_v27  ;;  %v583_v18 = vor.u32 %v582_v53, %v581_v13  ;;  %v587_v24 = vshll.u32 %v1050_v21, %v572_v30 }
  0xee   : > { %v433_v12 = vmul.f32 %v432_v15, %v430_v56  ;;  %v437_v28 = vsel %vm352_vm8, %v436_v36, %v1292_v22  ;;  %v1393_v6 = vsub.s32 %v514_v49, %v517_v19  ;;  %vm590_vm9 = vcmp.lt.s32.totalorder %v1361_v58, 1 }
  0xef   : > { %v606_v46 = vshll.u32 %v566_v14, 8  ;;  %v589_v26 = vor.u32 %v588_v17, %v587_v24  ;;  %vm593_vm10 = vcmp.lt.s32.totalorder %v1361_v58, 4  ;;  %v598_v27 = vsel %vm590_vm9, %v577_v7, %v580_v3 }
  0xf0   : > { %v434_v23 = vxor.u32 2147483648, %v433_v12  ;;  %v520_v29 = vsub.s32 0, %v1393_v6  ;;  %v574_v21 = vshrl.u32 %v1046_v11, %v573_v5  ;;  %vm592_vm11 = vcmp.lt.s32.totalorder %v1361_v58, 3 }
  0xf1   : > { %v599_v30 = vsel %vm593_vm10, %v586_v4, 920167782  ;;  %vm591_vm12 = vcmp.lt.s32.totalorder %v1361_v58, 2  ;;  %v595_v14 = vsel %vm593_vm10, %v583_v18, 2102212464  ;;  %v602_v34 = vsel %vm590_vm9, %v580_v3, %v583_v18  ;;  %v662_v58 = vld [vmem:[%s1160_s25] sm:$0xff] }
  0xf2   : > { %v435_v22 = vsel %vm352_vm8, %v434_v23, %v433_v12  ;;  %v600_v31 = vsel %vm592_vm11, %v583_v18, %v599_v30  ;;  %v810_v33 = vmin.u32 %v520_v29, %v1393_v6  ;;  %v603_v35 = vsel %vm593_vm10, %v589_v26, 1326507024 }
  0xf3   : > { %v438_v32 = vsel %vm1383_vm7, %v1171_v41, %v435_v22  ;;  %v601_v11 = vsel %vm591_vm12, %v598_v27, %v600_v31  ;;  %v594_v61 = vsel %vm590_vm9, %v574_v21, %v577_v7  ;;  %v596_v5 = vsel %vm592_vm11, %v580_v3, %v595_v14  ;;  %v663_v22 = vld [vmem:[%s1160_s25 + $0x8] sm:$0xff] }
  0xf4   : > { %922 = vcosq.f32 %v438_v32  ;;  %v1415_v36 = vmul.u32.u64.low %v606_v46, %v601_v11  ;;  %v1416_v38 = vmul.u32.u64.high %v606_v46, %v601_v11, %v1415_v36  ;;  %v522_v45 = vclz %v810_v33 }
  0xf5   : > { %924 = vsinq.f32 %v438_v32  ;;  %v604_v59 = vsel %vm592_vm11, %v586_v4, %v603_v35  ;;  %vm338_vm13 = vweird.f32 %v1169_v40  ;;  %v439_v37 = vsel %vm1383_vm7, 0, %v437_v28 }
  0xf6   : > { %v811_v39 = vadd.s32 4294967294, %v522_v45  ;;  %v605_v44 = vsel %vm591_vm12, %v602_v34, %v604_v59  ;;  %vm341_vm14 = vcmp.lt.s32.totalorder %v340_v10, 2  ;;  %vm342_vm15 = vcmp.eq.s32.totalorder %v340_v10, 0 }
  0xf7   : > { %v1430_v49 = vmul.u32.u64.low %v606_v46, %v605_v44  ;;  %v1431_v9 = vmul.u32.u64.high %v606_v46, %v605_v44, %v1430_v49  ;;  %v597_v47 = vsel %vm591_vm12, %v594_v61, %v596_v5  ;;  %v616_v54 = vadd.s32 1, %v1416_v38 }
  0xf8   : > { %vm812_vm0 = vcmp.lt.s32.totalorder %v811_v39, 0  ;;  %vm345_vm1 = vcmp.eq.s32.totalorder %v340_v10, 2  ;;  %v443_v55 = vadd.s32 3, %v439_v37  ;;  %v510_v53 = vadd.s32 %v1347_v20, %v1344_v16 }
  0xf9   : > { %v919_v48 = vpop.eup %918  ;;  %v525_v43 = vsel %vm812_vm0, 0, %v811_v39  ;;  %v613_v15 = vmul.u32 %v606_v46, %v597_v47  ;;  %vm615_vm2 = vc.u32 %v1431_v9, %v1415_v36  ;;  %vm442_vm6 = vweird.f32 %v1171_v41 }
  0xfa   : > { %v921_v51 = vpop.eup %920  ;;  %v346_v52 = vxor.u32 2147483648, %v919_v48  ;;  %v526_v8 = vsub.s32 32, %v525_v43  ;;  %v530_v57 = vsub.s32 4294967266, %v525_v43  ;;  %v527_v62 = vshll.u32 %v1393_v6, %v525_v43 }
  0xfb   : > { %v343_v60 = vxor.u32 2147483648, %v921_v51  ;;  %v617_v17 = vsel %vm615_vm2, %v616_v54, %v1416_v38  ;;  %v444_v25 = vand.u32 3, %v443_v55  ;;  %vm456_vm7 = vcmp.lt.s32.totalorder %v1173_v42, 0 }
  0xfc   : > { %v347_v13 = vsel %vm345_vm1, %v346_v52, %v921_v51  ;;  %v528_v56 = vshrl.u32 %v510_v53, %v526_v8  ;;  %v531_v3 = vadd.s32 127, %v530_v57  ;;  %v618_v20 = vadd.s32 %v617_v17, %v613_v15  ;;  %v664_v15 = vld [vmem:[%s1160_s25 + $0x10] sm:$0xff] }
  0xfd   : > { %v344_v7 = vsel %vm342_vm15, %v919_v48, %v343_v60  ;;  %vm449_vm3 = vcmp.eq.s32.totalorder %v444_v25, 2  ;;  %vm446_vm4 = vcmp.eq.s32.totalorder %v444_v25, 0  ;;  %vm445_vm5 = vcmp.lt.s32.totalorder %v444_v25, 2 }
  0xfe   : > { %v348_v1 = vsel %vm341_vm14, %v344_v7, %v347_v13  ;;  %v529_v19 = vor.u32 %v528_v56, %v527_v62  ;;  %v532_v4 = vshll.u32 %v531_v3, 23  ;;  %v619_v18 = vadd.s32 536870912, %v618_v20 }
  0xff   : > { %v349_v16 = vsel %vm338_vm13, nan, %v348_v1  ;;  %v540_v11 = vsub.s32 4, %v1377_v0  ;;  %vm455_vm8 = vcmp.le.f32.partialorder %v454_v63, 0.7853982  ;;  %v614_v48 = vadd.s32 %v1415_v36, %v1431_v9 }
 0x100   : > { %v666_v12 = vadd.f32 %v662_v58, %v349_v16  ;;  %v533_v28 = vor.u32 4788187, %v532_v4  ;;  %v1452_v46 = vshrl.u32 %v619_v18, 30  ;;  %v536_v26 = vcvt.s32.f32 %v529_v19 }
 0x101   : > { %v923_v24 = vpop.eup %922  ;;  %v541_v41 = vsel %vm456_vm7, %v540_v11, %v1377_v0  ;;  %vm546_vm13 = vweird.f32 %v1173_v42  ;;  %vm560_vm14 = vcmp.lt.s32.totalorder %v1185_v2, 0  ;;  %vm559_vm15 = vcmp.le.f32.partialorder %v558_v50, 0.7853982 }
 0x102   : > { %670 = vst [vmem:[%s1449_s21] sm:$0xff] %v666_v12  ;;  %v925_v10 = vpop.eup %924  ;;  %v450_v6 = vxor.u32 2147483648, %v923_v24  ;;  %v534_v23 = vand.u32 2147483647, %v533_v28  ;;  %v621_v29 = vshll.u32 %v1452_v46, 30  ;;  %v543_v37 = vsel %vm455_vm8, 0, %v541_v41 }
 0x103   : > { %v447_v40 = vxor.u32 2147483648, %v925_v10  ;;  %v547_v44 = vadd.s32 3, %v543_v37  ;;  %v644_v3 = vsub.s32 4, %v1452_v46 }
 0x104   : > { %v451_v27 = vsel %vm449_vm3, %v450_v6, %v925_v10  ;;  %v537_v30 = vmul.f32 %v536_v26, %v534_v23  ;;  %v622_v31 = vsub.s32 %v618_v20, %v621_v29  ;;  %v665_v6 = vld [vmem:[%s1160_s25 + $0x18] sm:$0xff]  ;;  %vm650_vm3 = vweird.f32 %v1185_v2 }
 0x105   : > { %v448_v21 = vsel %vm446_vm4, %v923_v24, %v447_v40  ;;  %v548_v54 = vand.u32 3, %v547_v44 }
 0x106   : > { %v452_v14 = vsel %vm445_vm5, %v448_v21, %v451_v27  ;;  %v538_v33 = vxor.u32 2147483648, %v537_v30  ;;  %v624_v34 = vsub.s32 0, %v622_v31 }
 0x107   : > { %v453_v32 = vsel %vm442_vm6, nan, %v452_v14  ;;  %vm553_vm10 = vcmp.eq.s32.totalorder %v548_v54, 2  ;;  %vm550_vm11 = vcmp.eq.s32.totalorder %v548_v54, 0  ;;  %vm549_vm12 = vcmp.lt.s32.totalorder %v548_v54, 2 }
 0x108   : > { %v667_v35 = vadd.f32 %v663_v22, %v453_v32  ;;  %v539_v38 = vsel %vm456_vm7, %v538_v33, %v537_v30  ;;  %v814_v61 = vmin.u32 %v624_v34, %v622_v31 }
 0x109   : > { %v542_v45 = vsel %vm455_vm8, %v1173_v42, %v539_v38  ;;  %v645_v42 = vsel %vm560_vm14, %v644_v3, %v1452_v46 }
 0x10a   : > { %671 = vst [vmem:[%s1449_s21 + $0x8] sm:$0xff] %v667_v35  ;;  %926 = vcosq.f32 %v542_v45  ;;  %v626_v5 = vclz %v814_v61  ;;  %v647_v25 = vsel %vm559_vm15, 0, %v645_v42 }
 0x10b   : > { %928 = vsinq.f32 %v542_v45  ;;  %v651_v19 = vadd.s32 3, %v647_v25 }
 0x10c   : > { %v815_v59 = vadd.s32 4294967294, %v626_v5 }
 0x10d   : > { %v652_v4 = vand.u32 3, %v651_v19 }
 0x10e   : > { %vm816_vm9 = vcmp.lt.s32.totalorder %v815_v59, 0 }
 0x10f   : > { %v629_v39 = vsel %vm816_vm9, 0, %v815_v59  ;;  %vm657_vm0 = vcmp.eq.s32.totalorder %v652_v4, 2  ;;  %vm654_vm1 = vcmp.eq.s32.totalorder %v652_v4, 0  ;;  %vm653_vm2 = vcmp.lt.s32.totalorder %v652_v4, 2 }
 0x110   : > { %v630_v49 = vsub.s32 32, %v629_v39  ;;  %v634_v63 = vsub.s32 4294967266, %v629_v39  ;;  %v631_v51 = vshll.u32 %v622_v31, %v629_v39 }
 0x112   : > { %v632_v52 = vshrl.u32 %v614_v48, %v630_v49  ;;  %v635_v47 = vadd.s32 127, %v634_v63 }
 0x114   : > { %v633_v60 = vor.u32 %v632_v52, %v631_v51  ;;  %v636_v55 = vshll.u32 %v635_v47, 23 }
 0x116   : > { %v637_v43 = vor.u32 4788187, %v636_v55  ;;  %v640_v7 = vcvt.s32.f32 %v633_v60 }
 0x117   : > { %v927_v0 = vpop.eup %926 }
 0x118   : > { %v929_v13 = vpop.eup %928  ;;  %v554_v53 = vxor.u32 2147483648, %v927_v0  ;;  %v638_v57 = vand.u32 2147483647, %v637_v43 }
 0x119   : > { %v551_v8 = vxor.u32 2147483648, %v929_v13 }
 0x11a   : > { %v555_v36 = vsel %vm553_vm10, %v554_v53, %v929_v13  ;;  %v641_v62 = vmul.f32 %v640_v7, %v638_v57 }
 0x11b   : > { %v552_v9 = vsel %vm550_vm11, %v927_v0, %v551_v8 }
 0x11c   : > { %v556_v58 = vsel %vm549_vm12, %v552_v9, %v555_v36  ;;  %v642_v56 = vxor.u32 2147483648, %v641_v62 }
 0x11d   : > { %v557_v1 = vsel %vm546_vm13, nan, %v556_v58 }
 0x11e   : > { %v668_v17 = vadd.f32 %v664_v15, %v557_v1  ;;  %v643_v16 = vsel %vm560_vm14, %v642_v56, %v641_v62 }
 0x11f   : > { %v646_v20 = vsel %vm559_vm15, %v1185_v2, %v643_v16 }
 0x120   : > { %672 = vst [vmem:[%s1449_s21 + $0x10] sm:$0xff] %v668_v17  ;;  %930 = vcosq.f32 %v646_v20 }
 0x121   : > { %932 = vsinq.f32 %v646_v20 }
 0x12d   : > { %v931_v12 = vpop.eup %930 }
 0x12e   : > { %v933_v18 = vpop.eup %932  ;;  %v658_v24 = vxor.u32 2147483648, %v931_v12 }
 0x12f   : > { %v655_v28 = vxor.u32 2147483648, %v933_v18 }
 0x130   : > { %v659_v50 = vsel %vm657_vm0, %v658_v24, %v933_v18 }
 0x131   : > { %v656_v10 = vsel %vm654_vm1, %v931_v12, %v655_v28 }
 0x132   : > { %v660_v46 = vsel %vm653_vm2, %v656_v10, %v659_v50 }
 0x133   : > { %v661_v40 = vsel %vm650_vm3, nan, %v660_v46 }
 0x134   : > { %v669_v23 = vadd.f32 %v665_v6, %v661_v40 }
 0x136   : > { %673 = vst [vmem:[%s1449_s21 + $0x18] sm:$0xff] %v669_v23 }
 0x137   : > { %975 = shalt.err (!%p972_p3)
}
 0x138   : > { %s976_s15 = scalar_lea.hbm %s689_s4, 512  ;;  %s980_s19 = scalar_lea.hbm %s1521_s2, 1024 }
 0x139   : > { %p977_p5 = scmp.ne.s32.totalorder %s689_s4, %s976_s15  ;;  %p981_p10 = scmp.lt.s32.totalorder %s689_s4, %s1521_s2 }
 0x13a   : > { %p982_p4 = scmp.lt.s32.totalorder %s980_s19, %s976_s15 }
 0x13b   : > { %p978_p6 = pnand %p977_p5, %p1119_p9 }
 0x13c   : > { %p983_p13 = por %p982_p4, %p981_p10 }
 0x13d   : > { %p979_p7 = pneg %p978_p6 }
 0x13f   : > { %p984_p8 = pnand %p983_p13, %p979_p7 }
 0x141   : > { %987 = shalt.err (!%p984_p8)
}
 0x142   : > { %842 = dma.vmem_to_hbm [thread:$0]  (%p1119_p9), %s692_s29, 512, %s689_s4, %s675_s5  }
 0x143 PF: > { %s703_s26 = sand.u32 1, %s1022_s9   ;;  %p1531_p11 = scmp.ne.s32.totalorder %s1525_s24, 0 }
 0x144   : > { %p1532_p12 = scmp.ge.s32.totalorder %s1042_s14, 2  ;;  %s704_s27 = scalar_lea.sflag [#allocation4], %s703_s26 }
 0x146   : > { %p849_p0 = pnand %p1532_p12, %p1531_p11 }
 0x148   : > { %p850_p1 = pneg %p849_p0 }
 0x14a   : > { %1017 = dma.done.wait (%p850_p1), %s704_s27, 512  }
 0x14b   : > { %1019 = vsyncadd (%p850_p1), %s704_s27, 4294966784  ;;  %s18_s14 = sadd.s32 1, %s1042_s14   ;;  %s1533_s9 = smov %s1026_s10 }
 0x14c   : > { %p15_p2 = scmp.ge.s32.totalorder %s18_s14, 4   ;;  %s1534_s10 = smov %s1030_s11 }
 0x14d   : > { %s1535_s11 = smov %s1124_s23  ;;  %s1536_s12 = smov %s1038_s13 }
 0x14e   : > { %s1537_s13 = smov %s1539_s17  ;;  %17 = sbr.rel (!%p15_p2) target bundleno = 6 (0x6), region = 76 }
 0x153   :  { %709 = vsyncpa [#allocation3], 1 }
 0x154   :  { %711 = vsyncpa [#allocation3 + $0x1], 1 }
 0x155   :  { %712 = vsyncpa [#allocation4], 1 }
 0x156   :  { %714 = vsyncpa [#allocation4 + $0x1], 1 }

</bundles_post_ra>
